<compile_context>
chip_gen: v7x
topology: tpu7x:2x2x1
jax: 0.10.0
libtpu: 0.0.40
codegen_flags: <defaults>
</compile_context>

<pallas_src>
import jax
import jax.numpy as jnp
from jax import lax
from jax.experimental import pallas as pl
from jax.experimental.pallas import tpu as pltpu

BN_EPS = 1e-5


def dense_res_kernel(x_ref, w1_ref, w2_ref, p_ref, o_ref):
    """One (tile_b, F) batch tile through both residual blocks.

    x_ref         : (tile_b, F) f32  activation tile
    w1_ref, w2_ref: (F, F)      bf16 Linear weights, pre-transposed to [in, out]
    p_ref         : (8, F)      f32  packed per-feature rows:
                    [b1, scale1, shift1, b2, scale2, shift2, 0, 0]
                    with scale_k = gamma_k * rsqrt(rv_k + eps)
                         shift_k = beta_k  - rm_k * scale_k
    o_ref         : (tile_b, F) f32
    """
    b1 = p_ref[0:1, :]
    s1 = p_ref[1:2, :]
    t1 = p_ref[2:3, :]
    b2 = p_ref[3:4, :]
    s2 = p_ref[4:5, :]
    t2 = p_ref[5:6, :]

    # ---- block 1: Linear -> ReLU -> residual -> folded BN (eval) ----
    # bf16 operands run the MXU at full rate on v5e/v6e/v7x; accumulate in f32.
    y = jnp.dot(x_ref[...].astype(jnp.bfloat16), w1_ref[...],
                preferred_element_type=jnp.float32) + b1
    y = jnp.maximum(y, 0.0)
    # Residual: re-read x from the VMEM-resident tile (cheap) rather than
    # keeping the f32 copy live across the matmul.
    h = (x_ref[...] + y) * s1 + t1

    # Dropout1d: identity in eval mode.

    # ---- block 2: Linear -> ReLU -> residual -> folded BN (eval) ----
    y2 = jnp.dot(h.astype(jnp.bfloat16), w2_ref[...],
                 preferred_element_type=jnp.float32) + b2
    y2 = jnp.maximum(y2, 0.0)
    o_ref[...] = (h + y2) * s2 + t2


def _pick_tile_b(batch, cap=256):
    """Largest multiple of 8 dividing `batch`, capped; prefer >=2 grid steps so
    the batch axis can shard across v7x's two TensorCores."""
    hi = min(cap, batch)
    if batch >= 16:
        hi = min(hi, batch // 2)      # guarantee at least 2 grid steps
    t = (hi // 8) * 8
    while t >= 8:
        if batch % t == 0:
            return t
        t -= 8
    return batch                       # tiny batch: single full-extent block


def dense_res_forward(x, params, *, tile_b=None):
    """x: (B, ...) -> flattened to (B, feat_dim). Returns (B, feat_dim) f32."""
    B = x.shape[0]
    x2d = x.reshape(B, -1).astype(jnp.float32)
    F = x2d.shape[1]
    assert F % 128 == 0, "feat_dim must be lane-aligned (multiple of 128)"
    if tile_b is None:
        tile_b = _pick_tile_b(B)
    assert B % tile_b == 0
    assert tile_b % 8 == 0 or tile_b == B

    # MXU operands in bf16 (accumulation stays f32 inside the kernel).
    w1t = params["w1"].T.astype(jnp.bfloat16)
    w2t = params["w2"].T.astype(jnp.bfloat16)

    # Fold BatchNorm (eval) into one scale/shift per layer and pack all
    # per-feature rows into a single (8, F) block: one DMA instead of twelve.
    def fold(g, be, rm, rv):
        scale = g * lax.rsqrt(rv + BN_EPS)
        return scale, be - rm * scale

    s1, t1 = fold(params["g1"], params["be1"], params["rm1"], params["rv1"])
    s2, t2 = fold(params["g2"], params["be2"], params["rm2"], params["rv2"])
    zeros = jnp.zeros((F,), jnp.float32)
    p_pack = jnp.stack(
        [params["b1"].astype(jnp.float32), s1, t1,
         params["b2"].astype(jnp.float32), s2, t2, zeros, zeros], axis=0)

    # Constant-index blocks never change across grid steps -> single buffer.
    const = lambda shape: pl.BlockSpec(shape, lambda i: (0, 0),
                                       pipeline_mode=pl.Buffered(1))
    x_spec = pl.BlockSpec((tile_b, F), lambda i: (i, 0))

    # VMEM budget: double-buffered x/out f32 tiles + single-buffered bf16
    # weights + param pack, with headroom; capped below the v7x 64 MiB ceiling.
    est = 2 * 2 * (tile_b * F * 4) + 2 * (F * F * 2) + 2 * (8 * F * 4)
    vmem_limit = int(min(max(4 * est, 16 << 20), 48 << 20))

    out = pl.pallas_call(
        dense_res_kernel,
        out_shape=jax.ShapeDtypeStruct((B, F), jnp.float32),
        grid_spec=pltpu.PrefetchScalarGridSpec(
            num_scalar_prefetch=0,
            grid=(B // tile_b,),
            in_specs=[x_spec, const((F, F)), const((F, F)), const((8, F))],
            out_specs=x_spec,
        ),
        compiler_params=pltpu.CompilerParams(
            dimension_semantics=("parallel",),
            vmem_limit_bytes=vmem_limit),
    )(x2d, w1t, w2t, p_pack)
    return out


def init_params(key, feat_dim):
    ks = jax.random.split(key, 12)
    F = feat_dim
    scale = 1.0 / jnp.sqrt(F)
    return {
        # Linear weights in PyTorch convention (out, in)
        "w1": jax.random.uniform(ks[0], (F, F), jnp.float32, -scale, scale),
        "b1": jax.random.uniform(ks[1], (F,), jnp.float32, -scale, scale),
        "w2": jax.random.uniform(ks[2], (F, F), jnp.float32, -scale, scale),
        "b2": jax.random.uniform(ks[3], (F,), jnp.float32, -scale, scale),
        # BatchNorm1d params + running stats (deterministic, non-trivial)
        "g1": 1.0 + 0.1 * jax.random.normal(ks[4], (F,), jnp.float32),
        "be1": 0.1 * jax.random.normal(ks[5], (F,), jnp.float32),
        "rm1": 0.05 * jax.random.normal(ks[6], (F,), jnp.float32),
        "rv1": 1.0 + 0.1 * jax.random.uniform(ks[7], (F,), jnp.float32),
        "g2": 1.0 + 0.1 * jax.random.normal(ks[8], (F,), jnp.float32),
        "be2": 0.1 * jax.random.normal(ks[9], (F,), jnp.float32),
        "rm2": 0.05 * jax.random.normal(ks[10], (F,), jnp.float32),
        "rv2": 1.0 + 0.1 * jax.random.uniform(ks[11], (F,), jnp.float32),
    }


def dense_res_ref(x, p, *, matmul_dtype=jnp.float32):
    """Pure-JAX reference (eval-mode PyTorch semantics)."""
    B = x.shape[0]
    x = x.reshape(B, -1).astype(jnp.float32)

    def lin(v, w, b):
        return jnp.dot(v.astype(matmul_dtype), w.T.astype(matmul_dtype),
                       preferred_element_type=jnp.float32) + b

    y = jnp.maximum(lin(x, p["w1"], p["b1"]), 0.0)
    h = x + y
    h = (h - p["rm1"]) / jnp.sqrt(p["rv1"] + BN_EPS) * p["g1"] + p["be1"]
    y2 = jnp.maximum(lin(h, p["w2"], p["b2"]), 0.0)
    h2 = h + y2
    return (h2 - p["rm2"]) / jnp.sqrt(p["rv2"] + BN_EPS) * p["g2"] + p["be2"]


if __name__ == "__main__":
    key = jax.random.PRNGKey(0)
    k_x, k_p = jax.random.split(key)

    # (B, 4, 32) -> flatten(1) -> feat_dim = 128. B=256 -> tile_b=128, grid=2.
    B, C, L = 256, 4, 32
    feat_dim = C * L
    x = jax.random.normal(k_x, (B, C, L), jnp.float32)
    params = init_params(k_p, feat_dim)

    out = jax.block_until_ready(dense_res_forward(x, params))
    assert out.shape == (B, feat_dim)

    # Tight check vs a reference that uses the same bf16 MXU operands.
    ref_bf16 = dense_res_ref(x, params, matmul_dtype=jnp.bfloat16)
    err_bf16 = float(jnp.max(jnp.abs(out - ref_bf16)))
    assert jnp.allclose(out, ref_bf16, atol=5e-3, rtol=5e-3), err_bf16

    # Loose sanity check vs the pure-f32 reference (bf16 matmul rounding).
    ref_f32 = dense_res_ref(x, params)
    err_f32 = float(jnp.max(jnp.abs(out - ref_f32)))
    assert jnp.allclose(out, ref_f32, atol=5e-2, rtol=5e-2), err_f32

    print("KERNEL_OK")
</pallas_src>

<mosaic_0001>
module attributes {stable_mosaic.version = 11 : i64} {
  func.func @dense_res_kernel(%arg0: i32, %arg1: memref<128x128xf32, #tpu.memory_space<vmem>>, %arg2: memref<128x128xbf16, #tpu.memory_space<vmem>>, %arg3: memref<128x128xbf16, #tpu.memory_space<vmem>>, %arg4: memref<8x128xf32, #tpu.memory_space<vmem>>, %arg5: memref<128x128xf32, #tpu.memory_space<vmem>>) attributes {dimension_semantics = [#tpu.dimension_semantics<parallel>], iteration_bounds = array<i64: 2>, scalar_prefetch = 0 : i64, scratch_operands = 0 : i64, tpu.core_type = #tpu.core_type<tc>, window_params = [{transform_indices = @transform_0, window_bounds = array<i64: 128, 128>}, {pipeline_mode = #tpu.pipeline_mode<synchronous>, transform_indices = @transform_1, window_bounds = array<i64: 128, 128>}, {pipeline_mode = #tpu.pipeline_mode<synchronous>, transform_indices = @transform_2, window_bounds = array<i64: 128, 128>}, {pipeline_mode = #tpu.pipeline_mode<synchronous>, transform_indices = @transform_3, window_bounds = array<i64: 8, 128>}, {transform_indices = @transform_4, window_bounds = array<i64: 128, 128>}]} {
    %c0 = arith.constant 0 : index
    %c0_0 = arith.constant 0 : index
    %0 = vector.load %arg4[%c0, %c0_0] : memref<8x128xf32, #tpu.memory_space<vmem>>, vector<1x128xf32>
    %c1 = arith.constant 1 : index
    %c0_1 = arith.constant 0 : index
    %1 = vector.load %arg4[%c1, %c0_1] : memref<8x128xf32, #tpu.memory_space<vmem>>, vector<1x128xf32>
    %c2 = arith.constant 2 : index
    %c0_2 = arith.constant 0 : index
    %2 = vector.load %arg4[%c2, %c0_2] : memref<8x128xf32, #tpu.memory_space<vmem>>, vector<1x128xf32>
    %c3 = arith.constant 3 : index
    %c0_3 = arith.constant 0 : index
    %3 = vector.load %arg4[%c3, %c0_3] : memref<8x128xf32, #tpu.memory_space<vmem>>, vector<1x128xf32>
    %c4 = arith.constant 4 : index
    %c0_4 = arith.constant 0 : index
    %4 = vector.load %arg4[%c4, %c0_4] : memref<8x128xf32, #tpu.memory_space<vmem>>, vector<1x128xf32>
    %c5 = arith.constant 5 : index
    %c0_5 = arith.constant 0 : index
    %5 = vector.load %arg4[%c5, %c0_5] : memref<8x128xf32, #tpu.memory_space<vmem>>, vector<1x128xf32>
    %c0_6 = arith.constant 0 : index
    %c0_7 = arith.constant 0 : index
    %6 = vector.load %arg1[%c0_6, %c0_7] : memref<128x128xf32, #tpu.memory_space<vmem>>, vector<128x128xf32>
    %7 = arith.truncf %6 : vector<128x128xf32> to vector<128x128xbf16>
    %c0_8 = arith.constant 0 : index
    %c0_9 = arith.constant 0 : index
    %8 = vector.load %arg2[%c0_8, %c0_9] : memref<128x128xbf16, #tpu.memory_space<vmem>>, vector<128x128xbf16>
    %cst = arith.constant dense<0.000000e+00> : vector<128x128xf32>
    %9 = tpu.matmul %7, %8, %cst {dimension_numbers = #tpu.dot_dimension_numbers<[1], [0], [0], [1], [0, 0, 1, 1], [], []>} : vector<128x128xbf16>, vector<128x128xbf16>, vector<128x128xf32> -> vector<128x128xf32>
    %10 = vector.broadcast %0 : vector<1x128xf32> to vector<128x128xf32>
    %11 = arith.addf %9, %10 : vector<128x128xf32>
    %cst_10 = arith.constant 0.000000e+00 : f32
    %12 = vector.broadcast %cst_10 : f32 to vector<128x128xf32>
    %13 = arith.maximumf %11, %12 : vector<128x128xf32>
    %c0_11 = arith.constant 0 : index
    %c0_12 = arith.constant 0 : index
    %14 = vector.load %arg1[%c0_11, %c0_12] : memref<128x128xf32, #tpu.memory_space<vmem>>, vector<128x128xf32>
    %15 = arith.addf %14, %13 : vector<128x128xf32>
    %16 = vector.broadcast %1 : vector<1x128xf32> to vector<128x128xf32>
    %17 = arith.mulf %15, %16 : vector<128x128xf32>
    %18 = vector.broadcast %2 : vector<1x128xf32> to vector<128x128xf32>
    %19 = arith.addf %17, %18 : vector<128x128xf32>
    %20 = arith.truncf %19 : vector<128x128xf32> to vector<128x128xbf16>
    %c0_13 = arith.constant 0 : index
    %c0_14 = arith.constant 0 : index
    %21 = vector.load %arg3[%c0_13, %c0_14] : memref<128x128xbf16, #tpu.memory_space<vmem>>, vector<128x128xbf16>
    %cst_15 = arith.constant dense<0.000000e+00> : vector<128x128xf32>
    %22 = tpu.matmul %20, %21, %cst_15 {dimension_numbers = #tpu.dot_dimension_numbers<[1], [0], [0], [1], [0, 0, 1, 1], [], []>} : vector<128x128xbf16>, vector<128x128xbf16>, vector<128x128xf32> -> vector<128x128xf32>
    %23 = vector.broadcast %3 : vector<1x128xf32> to vector<128x128xf32>
    %24 = arith.addf %22, %23 : vector<128x128xf32>
    %cst_16 = arith.constant 0.000000e+00 : f32
    %25 = vector.broadcast %cst_16 : f32 to vector<128x128xf32>
    %26 = arith.maximumf %24, %25 : vector<128x128xf32>
    %27 = arith.addf %19, %26 : vector<128x128xf32>
    %28 = vector.broadcast %4 : vector<1x128xf32> to vector<128x128xf32>
    %29 = arith.mulf %27, %28 : vector<128x128xf32>
    %30 = vector.broadcast %5 : vector<1x128xf32> to vector<128x128xf32>
    %31 = arith.addf %29, %30 : vector<128x128xf32>
    %c0_17 = arith.constant 0 : index
    %c0_18 = arith.constant 0 : index
    %32 = vector.load %arg5[%c0_17, %c0_18] : memref<128x128xf32, #tpu.memory_space<vmem>>, vector<128x128xf32>
    tpu.vector_store %arg5[%c0_17, %c0_18], %31 {strides = array<i32>} : memref<128x128xf32, #tpu.memory_space<vmem>>, vector<128x128xf32>,
    return
  }
  func.func @transform_0(%arg0: i32) -> (i32, i32) {
    %c0_i32 = arith.constant 0 : i32
    %c0_i32_0 = arith.constant 0 : i32
    return %arg0, %c0_i32 : i32, i32
  }
  func.func @transform_1(%arg0: i32) -> (i32, i32) {
    %c0_i32 = arith.constant 0 : i32
    %c0_i32_0 = arith.constant 0 : i32
    %c0_i32_1 = arith.constant 0 : i32
    return %c0_i32, %c0_i32_0 : i32, i32
  }
  func.func @transform_2(%arg0: i32) -> (i32, i32) {
    %c0_i32 = arith.constant 0 : i32
    %c0_i32_0 = arith.constant 0 : i32
    %c0_i32_1 = arith.constant 0 : i32
    return %c0_i32, %c0_i32_0 : i32, i32
  }
  func.func @transform_3(%arg0: i32) -> (i32, i32) {
    %c0_i32 = arith.constant 0 : i32
    %c0_i32_0 = arith.constant 0 : i32
    %c0_i32_1 = arith.constant 0 : i32
    return %c0_i32, %c0_i32_0 : i32, i32
  }
  func.func @transform_4(%arg0: i32) -> (i32, i32) {
    %c0_i32 = arith.constant 0 : i32
    %c0_i32_0 = arith.constant 0 : i32
    return %arg0, %c0_i32 : i32, i32
  }
}

</mosaic_0001>

<bundles_post_ra>
// kernel: tpu_custom_call.1
= control target key start
LH: loop header
LB: loop body
LE: loop exit
PB: predicated region body
PF: predicated region fallthrough
CT: control target
= control target key end

     0   :  { %9 = vsyncpa [#allocation3], 0  ;;  %s1823_s0 = inlined_call_operand.hbm [shape: f32[256,128], index: 0, kind: input, shape index: {}]   ;;  %s1824_s1 = inlined_call_operand.hbm [shape: bf16[128,128], index: 1, kind: input, shape index: {}]   ;;  %s1825_s2 = inlined_call_operand.hbm [shape: bf16[128,128], index: 2, kind: input, shape index: {}]   ;;  %s1826_s3 = inlined_call_operand.vmem [shape: f32[8,128], index: 3, kind: input, shape index: {}]   ;;  %s1827_s4 = inlined_call_operand.hbm [shape: f32[256,128], index: 4, kind: output, shape index: {}]  }
   0x1   :  { %11 = vsyncpa [#allocation3 + $0x1], 0 }
   0x2   :  { %12 = vsyncpa [#allocation6], 0 }
   0x3   :  { %13 = vsyncpa [#allocation4], 0 }
   0x4   :  { %15 = vsyncpa [#allocation4 + $0x1], 0  ;;  %s1302_s15 = smov 0   ;;  %s1304_s16 = smov 0  }
   0x5   :  { %s1306_s17 = smov 0   ;;  %s1308_s18 = smov 0  }
   0x6 LB: > { %s1323_s19 = sadd.s32 4294967295, %s1265_s18   ;;  %s882_s20 = sadd.s32 4294967294, %s1265_s18   ;;  %s1265_s18 = sphi %s1308_s18, %s1847_s18   ;;  %s1261_s17 = sphi %s1306_s17, %s1846_s17   ;;  %s1257_s16 = sphi %s1304_s16, %s1845_s16   ;;  %s1253_s15 = sphi %s1302_s15, %s1844_s15  }
   0x7   : > { %p41_p0 = scmp.ne.s32.totalorder %s1257_s16, %s1253_s15  ;;  %p1828_p1 = scmp.eq.s32.totalorder %s1323_s19, 0 }
   0x8   : > { %p134_p3 = scmp.eq.s32.totalorder %s882_s20, 1  ;;  %p883_p5 = scmp.ge.s32.totalorder %s1265_s18, 1 }
   0x9   : > { %p1332_p4 = por %p1828_p1, %p41_p0  ;;  %p141_p7 = scmp.lt.s32.totalorder %s1265_s18, 3 }
   0xa   : > { %p1337_p6 = por %p134_p3, %p41_p0  ;;  %s1267_s24 = smov [#allocation5]  }
   0xb   : > { %s1831_s21 = scalar_select %p1332_p4, 1, 0 }
   0xc   : > { %s1832_s22 = scalar_select %p1337_p6, 1, 0 }
   0xd   : > { %p1342_p8 = pnand %p883_p5, %p141_p7  ;;  %s153_s25 = sshll.u32 %s1267_s24, 4  ;;  %s1346_s25 = int_to_ptr.vmem [resolvable:$true] %s153_s25 }
   0xe   : > { %s1268_s27 = smov [#allocation7]   ;;  %s1109_s5 = scalar_lea.hbm %s1824_s1, 1024 }
   0xf   : > { %p1032_p9 = pneg %p1342_p8  ;;  %s166_s28 = sshll.u32 %s1268_s27, 4  ;;  %s1357_s28 = int_to_ptr.vmem [resolvable:$true] %s166_s28 }
  0x10   : > { %p1110_p12 = scmp.ne.s32.totalorder %s1824_s1, %s1109_s5  ;;  %p1116_p5 = scmp.lt.u32.totalorder %s1109_s5, %s1824_s1 }
  0x11   : > { %p1353_p11 = pnand %p1032_p9, %p1828_p1 }
  0x13   : > { %p1111_p13 = pneg %p1353_p11 }
  0x15   : > { %p1112_p0 = pnand %p1111_p13, %p1110_p12 }
  0x17   : > { %p1113_p3 = pneg %p1112_p0 }
  0x19   : > { %p1118_p7 = pnand %p1116_p5, %p1113_p3 }
  0x1b   : > { %1121 = shalt.err (!%p1118_p7)
}
  0x1c   : > { %s1122_s10 = scalar_lea.vmem %s1346_s25, 1024  ;;  %p1130_p2 = scmp.lt.s32.totalorder %s1346_s25, %s1346_s25 }
  0x1d   : > { %p1123_p9 = scmp.ne.s32.totalorder %s1346_s25, %s1122_s10  ;;  %p1131_p12 = scmp.lt.s32.totalorder %s1122_s10, %s1122_s10 }
  0x1f   : > { %p1125_p10 = pnand %p1123_p9, %p1111_p13  ;;  %p1132_p0 = por %p1131_p12, %p1130_p2 }
  0x21   : > { %p1126_p1 = pneg %p1125_p10 }
  0x23   : > { %p1133_p6 = pnand %p1132_p0, %p1126_p1 }
  0x25   : > { %1136 = shalt.err (!%p1133_p6)
}
  0x26   : > { %s1269_s11 = smov 64   ;;  %s1270_s12 = smov 4  }
  0x27   : > { %1035 = dma.hbm_to_vmem [thread:$0]  (!%p1353_p11), %s1824_s1, 1024, %s1346_s25, [#allocation6], %s1269_s11, %s1269_s11, %s1270_s12  }
  0x28   : > { %s1137_s27 = scalar_lea.hbm %s1825_s2, 1024 }
  0x29   : > { %p1138_p2 = scmp.ne.s32.totalorder %s1825_s2, %s1137_s27  ;;  %p1144_p10 = scmp.lt.u32.totalorder %s1137_s27, %s1825_s2 }
  0x2b   : > { %p1140_p1 = pnand %p1138_p2, %p1111_p13 }
  0x2d   : > { %p1141_p6 = pneg %p1140_p1 }
  0x2f   : > { %p1146_p3 = pnand %p1144_p10, %p1141_p6 }
  0x31   : > { %1149 = shalt.err (!%p1146_p3)
}
  0x32   : > { %s1150_s25 = scalar_lea.vmem %s1357_s28, 1024  ;;  %p1158_p12 = scmp.lt.s32.totalorder %s1357_s28, %s1357_s28 }
  0x33   : > { %p1151_p5 = scmp.ne.s32.totalorder %s1357_s28, %s1150_s25  ;;  %p1159_p0 = scmp.lt.s32.totalorder %s1150_s25, %s1150_s25 }
  0x35   : > { %p1153_p7 = pnand %p1151_p5, %p1111_p13  ;;  %p1160_p2 = por %p1159_p0, %p1158_p12 }
  0x37   : > { %p1154_p9 = pneg %p1153_p7 }
  0x39   : > { %p1161_p1 = pnand %p1160_p2, %p1154_p9 }
  0x3b   : > { %1164 = shalt.err (!%p1161_p1)
}
  0x3c   : > { %1038 = dma.hbm_to_vmem [thread:$0]  (!%p1353_p11), %s1825_s2, 1024, %s1357_s28, [#allocation6], %s1269_s11, %s1269_s11, %s1270_s12  }
  0x3d   : > { %s1412_s9 = sadd.s32 1, %s1265_s18   ;;  %s28_s26 = sadd.s32 1, %s1261_s17 }
  0x3e   : > { %s25_s10 = ssub.s32 %s1265_s18, %s1412_s9  ;;  %p35_p13 = scmp.ne.s32.totalorder %s1261_s17, %s1257_s16 }
  0x3f   : > { %p26_p6 = scmp.eq.s32.totalorder %s25_s10, 0  ;;  %p36_p10 = scmp.eq.s32.totalorder %s1265_s18, 0 }
  0x40   : > { %p1835_p3 = scmp.eq.s32.totalorder %s1323_s19, 1  ;;  %p1049_p7 = scmp.lt.s32.totalorder %s1265_s18, 2 }
  0x41   : > { %s1428_s14 = scalar_select %p26_p6, %s1261_s17, %s28_s26  }
  0x42   : > { %p1422_p5 = por %p1835_p3, %p35_p13  ;;  %p37_p9 = por %p36_p10, %p35_p13 }
  0x43   : > { %s183_s20 = sand.u32 1, %s1261_s17   ;;  %s922_s28 = sshll.u32 %s1265_s18, 11 }
  0x44   : > { %s1836_s13 = scalar_select %p1422_p5, 1, 0 }
  0x45   : > { %s887_s24 = sshll.u32 %s183_s20, 7  ;;  %s1435_s27 = scalar_lea.hbm %s1823_s0, %s922_s28 }
  0x46   : > { %s187_s29 = scalar_lea.vmem [#allocation2], %s887_s24  ;;  %p1439_p11 = pnand %p1049_p7, %p37_p9 }
  0x47   : > { %s194_s30 = sshll.u32 %s187_s29, 4  ;;  %s1443_s6 = scalar_lea.sflag [#allocation3], %s183_s20  ;;  %s1437_s30 = int_to_ptr.vmem [resolvable:$true] %s194_s30 }
  0x48   : > { %s1165_s25 = scalar_lea.hbm %s1435_s27, 2048  ;;  %p1167_p0 = pneg %p1439_p11 }
  0x49   : > { %p1166_p12 = scmp.ne.s32.totalorder %s1435_s27, %s1165_s25  ;;  %s1170_s26 = scalar_lea.hbm %s1823_s0, 4096 }
  0x4a   : > { %p1171_p13 = scmp.lt.u32.totalorder %s1435_s27, %s1823_s0  ;;  %p1172_p6 = scmp.lt.u32.totalorder %s1170_s26, %s1165_s25 }
  0x4b   : > { %p1168_p2 = pnand %p1167_p0, %p1166_p12  ;;  %p1174_p3 = scmp.lt.u32.totalorder %s1165_s25, %s1435_s27 }
  0x4c   : > { %p1173_p10 = por %p1172_p6, %p1171_p13 }
  0x4d   : > { %p1169_p1 = pneg %p1168_p2 }
  0x4e   : > { %p1175_p7 = por %p1174_p3, %p1173_p10 }
  0x50   : > { %p1176_p9 = pnand %p1175_p7, %p1169_p1 }
  0x52   : > { %1179 = shalt.err (!%p1176_p9)
}
  0x53   : > { %s1180_s20 = scalar_lea.vmem %s1437_s30, 2048  ;;  %s1271_s28 = smov [#allocation2]  }
  0x54   : > { %p1181_p12 = scmp.ne.s32.totalorder %s1437_s30, %s1180_s20  ;;  %s1185_s11 = sshll.u32 %s1271_s28, 4  ;;  %s1186_s11 = int_to_ptr.vmem [resolvable:$false] %s1185_s11 }
  0x55   : > { %s1187_s12 = scalar_lea.vmem %s1186_s11, 4096  ;;  %p1188_p4 = scmp.lt.s32.totalorder %s1437_s30, %s1186_s11 }
  0x56   : > { %p1183_p2 = pnand %p1181_p12, %p1167_p0  ;;  %p1189_p13 = scmp.lt.s32.totalorder %s1187_s12, %s1180_s20 }
  0x58   : > { %p1184_p5 = pneg %p1183_p2  ;;  %p1190_p6 = por %p1189_p13, %p1188_p4 }
  0x5a   : > { %p1191_p10 = pnand %p1190_p6, %p1184_p5 }
  0x5c   : > { %1194 = shalt.err (!%p1191_p10)
}
  0x5d   : > { %s1272_s29 = smov 128   ;;  %s1273_s25 = smov 8  }
  0x5e   : > { %1042 = dma.hbm_to_vmem [thread:$0]  (!%p1439_p11), %s1435_s27, 2048, %s1437_s30, %s1443_s6, %s1272_s29, %s1272_s29, %s1273_s25  }
  0x5f   : > { %206 = sbr.rel (%p1342_p8) target bundleno = 631 (0x277), region = 36  ;;  %s1474_s7 = sand.u32 (!%p1342_p8), 1, %s1257_s16  }
  0x60   : > { %s891_s8 = sshll.u32 (!%p1342_p8), %s1474_s7, 7  ;;  %s209_s26 = scalar_lea.sflag (!%p1342_p8), [#allocation3], %s1474_s7 }
  0x61   : > { %s1480_s10 = scalar_lea.vmem (!%p1342_p8), [#allocation2], %s891_s8  ;;  %p1838_p4 = scmp.ne.s32.totalorder (!%p1342_p8), %s1831_s21, 0 }
  0x66   : > { %1240 = dma.done.wait (%p1838_p4), %s209_s26, 2048  }
  0x67   : > { %1242 = vsyncadd (%p1838_p4), %s209_s26, 4294965248  ;;  %p1839_p5 = scmp.eq.s32.totalorder %s1323_s19, 0 }
  0x69   : > { %1244 = dma.done.wait (%p1839_p5), [#allocation6], 2048   ;;  %p1840_p8 = pmov %p1839_p5 }
  0x6a   : > { %v1093_v0 = vld [vmem:[#allocation5] sm:$0xff]   ;;  %v1094_v1 = vld [vmem:[#allocation5 + $0x8] sm:$0xff]   ;;  %v1095_v2 = vld [vmem:[#allocation5 + $0x10] sm:$0xff]   ;;  %s1706_s25 = scalar_lea.vmem [#allocation8], %s891_s8  ;;  %s923_s8 = sshll.u32 %s1323_s19, 11 }
  0x6b   : > { %1246 = vsyncadd (%p1840_p8), [#allocation6], 4294965248  ;;  %956 = vmatprep.subr.bf16.mxu0 %v1093_v0  ;;  %v1096_v3 = vld [vmem:[#allocation5 + $0x18] sm:$0xff]   ;;  %v1491_v4 = vld [vmem:[%s1480_s10] sm:$0xff]  ;;  %s790_s26 = sshll.u32 %s1706_s25, 4  ;;  %s1773_s23 = scalar_lea.hbm %s1827_s4, %s923_s8  ;;  %s1775_s26 = int_to_ptr.vmem [resolvable:$true] %s790_s26 }
  0x6c   : > { %957 = vmatpush3.bf16.msra.mxu0 %v1093_v0  ;;  %v1494_v5 = vld [vmem:[%s1480_s10 + $0x8] sm:$0xff]  ;;  %v1097_v7 = vld [vmem:[#allocation5 + $0x20] sm:$0xff]   ;;  %v1103_v11 = vld [vmem:[#allocation7 + $0x10] sm:$0xff]   ;;  %s777_s19 = scalar_lea.sflag [#allocation4], %s1474_s7  ;;  %s1195_s27 = scalar_lea.vmem %s1775_s26, 2048 }
  0x6d   : > { %958 = vmatprep.subr.bf16.mxu0 %v1094_v1  ;;  %v270_v6 = vpack.c.bf16 %v1494_v5, %v1491_v4  ;;  %v1101_v8 = vld [vmem:[#allocation7] sm:$0xff]   ;;  %v1102_v9 = vld [vmem:[#allocation7 + $0x8] sm:$0xff]   ;;  %v1099_v12 = vld [vmem:[#allocation5 + $0x30] sm:$0xff]   ;;  %p1196_p11 = scmp.ne.s32.totalorder %s1775_s26, %s1195_s27  ;;  %p1841_p0 = scmp.ne.s32.totalorder %s1836_s13, 0 }
  0x6e   : > { %v1098_v10 = vld [vmem:[#allocation5 + $0x28] sm:$0xff]   ;;  %988 = vmatprep.subr.bf16.mxu1 %v1101_v8  ;;  %v1104_v13 = vld [vmem:[#allocation7 + $0x18] sm:$0xff]   ;;  %v256_v15 = vld [vmem:[%s1480_s10 + $0x10] sm:$0xff]  ;;  %s1274_s30 = smov [#allocation8]  }
  0x6f   : > { %972 = vmatprep.mubr.bf16.mxu0 %v270_v6  ;;  %989 = vmatpush3.bf16.msra.mxu1 %v1101_v8  ;;  %v1100_v14 = vld [vmem:[#allocation5 + $0x38] sm:$0xff]   ;;  %v1501_v17 = vld [vmem:[%s1480_s10 + $0x20] sm:$0xff]  ;;  %v1504_v18 = vld [vmem:[%s1480_s10 + $0x28] sm:$0xff]  ;;  %p1197_p1 = pnand %p1196_p11, %p1841_p0  ;;  %s1199_s5 = sshll.u32 %s1274_s30, 4  ;;  %s1200_s5 = int_to_ptr.vmem [resolvable:$false] %s1199_s5 }
  0x70   : > { %959 = vmatpush3.bf16.msra.mxu0 %v1094_v1  ;;  %990 = vmatprep.subr.bf16.mxu1 %v1102_v9  ;;  %v257_v16 = vld [vmem:[%s1480_s10 + $0x18] sm:$0xff]  ;;  %v272_v20 = vpack.c.bf16 %v1504_v18, %v1501_v17  ;;  %v1509_v21 = vld [vmem:[%s1480_s10 + $0x30] sm:$0xff]  ;;  %v1515_v23 = vld [vmem:[%s1480_s10 + $0x40] sm:$0xff]  ;;  %s1201_s6 = scalar_lea.vmem %s1200_s5, 4096  ;;  %p1202_p7 = scmp.lt.s32.totalorder %s1775_s26, %s1200_s5 }
  0x71   : > { %960 = vmatprep.subr.bf16.mxu0 %v1095_v2  ;;  %v271_v19 = vpack.c.bf16 %v257_v16, %v256_v15  ;;  %v1512_v22 = vld [vmem:[%s1480_s10 + $0x38] sm:$0xff]  ;;  %v1518_v24 = vld [vmem:[%s1480_s10 + $0x48] sm:$0xff]  ;;  %v1525_v27 = vld [vmem:[%s1480_s10 + $0x50] sm:$0xff]  ;;  %p1198_p3 = pneg %p1197_p1  ;;  %p1203_p9 = scmp.lt.s32.totalorder %s1201_s6, %s1195_s27 }
  0x72   : > { %v273_v25 = vpack.c.bf16 %v1512_v22, %v1509_v21  ;;  %v274_v26 = vpack.c.bf16 %v1518_v24, %v1515_v23  ;;  %v1528_v28 = vld [vmem:[%s1480_s10 + $0x58] sm:$0xff]  ;;  %v1531_v29 = vld [vmem:[%s1480_s10 + $0x60] sm:$0xff]  ;;  %v1534_v30 = vld [vmem:[%s1480_s10 + $0x68] sm:$0xff] }
  0x73   : > { %991 = vmatpush3.bf16.msra.mxu1 %v1102_v9  ;;  %v275_v31 = vpack.c.bf16 %v1528_v28, %v1525_v27  ;;  %v276_v32 = vpack.c.bf16 %v1534_v30, %v1531_v29  ;;  %v1541_v33 = vld [vmem:[%s1480_s10 + $0x70] sm:$0xff]  ;;  %v1544_v34 = vld [vmem:[%s1480_s10 + $0x78] sm:$0xff]  ;;  %v1105_v36 = vld [vmem:[#allocation7 + $0x20] sm:$0xff]   ;;  %p1204_p12 = por %p1203_p9, %p1202_p7 }
  0x74   : > { %961 = vmatpush3.bf16.msra.mxu0 %v1095_v2  ;;  %992 = vmatprep.subr.bf16.mxu1 %v1103_v11  ;;  %v277_v35 = vpack.c.bf16 %v1544_v34, %v1541_v33  ;;  %v1106_v37 = vld [vmem:[#allocation7 + $0x28] sm:$0xff]   ;;  %v1107_v38 = vld [vmem:[#allocation7 + $0x30] sm:$0xff]   ;;  %v1108_v39 = vld [vmem:[#allocation7 + $0x38] sm:$0xff]  }
  0x75   : > { %962 = vmatprep.subr.bf16.mxu0 %v1096_v3  ;;  %v1551_v40 = vld [vmem:[%s1826_s3] ss:$0 sm:$0xff]  ;;  %v1560_v51 = vld [vmem:[%s1826_s3 + $0x1] ss:$0 sm:$0xff]  ;;  %v1571_v0 = vld [vmem:[%s1826_s3 + $0x2] ss:$0 sm:$0xff]  ;;  %p1205_p2 = pnand %p1204_p12, %p1198_p3 }
  0x77   : > { %993 = vmatpush3.bf16.msra.mxu1 %v1103_v11 }
  0x78   : > { %963 = vmatpush3.bf16.msra.mxu0 %v1096_v3  ;;  %994 = vmatprep.subr.bf16.mxu1 %v1104_v13 }
  0x79   : > { %964 = vmatprep.subr.bf16.mxu0 %v1097_v7 }
  0x7b   : > { %995 = vmatpush3.bf16.msra.mxu1 %v1104_v13 }
  0x7c   : > { %965 = vmatpush3.bf16.msra.mxu0 %v1097_v7  ;;  %996 = vmatprep.subr.bf16.mxu1 %v1105_v36 }
  0x7d   : > { %966 = vmatprep.subr.bf16.mxu0 %v1098_v10 }
  0x7f   : > { %997 = vmatpush3.bf16.msra.mxu1 %v1105_v36 }
  0x80   : > { %967 = vmatpush3.bf16.msra.mxu0 %v1098_v10  ;;  %998 = vmatprep.subr.bf16.mxu1 %v1106_v37 }
  0x81   : > { %968 = vmatprep.subr.bf16.mxu0 %v1099_v12 }
  0x83   : > { %999 = vmatpush3.bf16.msra.mxu1 %v1106_v37 }
  0x84   : > { %969 = vmatpush3.bf16.msra.mxu0 %v1099_v12  ;;  %1000 = vmatprep.subr.bf16.mxu1 %v1107_v38 }
  0x85   : > { %970 = vmatprep.subr.bf16.mxu0 %v1100_v14 }
  0x87   : > { %1001 = vmatpush3.bf16.msra.mxu1 %v1107_v38 }
  0x88   : > { %971 = vmatpush3.bf16.msra.mxu0 %v1100_v14  ;;  %1002 = vmatprep.subr.bf16.mxu1 %v1108_v39 }
  0x8b   : > { %973 = vmatmul.mubr.bf16.vlgmr.msra.gmra.mrb[0].mxu0 %v271_v19  ;;  %1003 = vmatpush3.bf16.msra.mxu1 %v1108_v39 }
  0x8c   : > { %976 = vmatprep.mubr.bf16.mxu0 %v272_v20 }
  0x93   : > { %977 = vmatmul.mubr.bf16.gmra.mrb[4].mxu0 %v273_v25 }
  0x94   : > { %980 = vmatprep.mubr.bf16.mxu0 %v274_v26 }
  0x9b   : > { %981 = vmatmul.mubr.bf16.gmra.mrb[8].mxu0 %v275_v31 }
  0x9c   : > { %984 = vmatprep.mubr.bf16.mxu0 %v276_v32 }
  0xa3   : > { %985 = vmatmul.mubr.bf16.gmra.mrb[12].mxu0 %v277_v35 }
 0x15e   : > { %v974_v41 = vpop.f32.mrb[0].mxu0 }
 0x15f   : > { %v389_v42 = vadd.f32 %v974_v41, %v1551_v40  ;;  %v380_v43 = vpop.f32.mrb[1].mxu0 }
 0x160   : > { %v381_v44 = vadd.f32 %v1551_v40, %v380_v43  ;;  %v975_v45 = vpop.f32.mrb[2].mxu0 }
 0x161   : > { %v445_v46 = vmax.f32 %v389_v42, 0.0  ;;  %v392_v47 = vadd.f32 %v975_v45, %v1551_v40  ;;  %v383_v48 = vpop.f32.mrb[3].mxu0 }
 0x162   : > { %v443_v49 = vmax.f32 %v381_v44, 0.0  ;;  %v384_v50 = vadd.f32 %v1551_v40, %v383_v48 }
 0x163   : > { %v461_v52 = vadd.f32 %v445_v46, %v256_v15  ;;  %v446_v53 = vmax.f32 %v392_v47, 0.0 }
 0x164   : > { %v459_v54 = vadd.f32 %v443_v49, %v1491_v4  ;;  %v444_v55 = vmax.f32 %v384_v50, 0.0 }
 0x165   : > { %v462_v56 = vadd.f32 %v446_v53, %v257_v16  ;;  %v481_v60 = vmul.f32 %v1560_v51, %v461_v52 }
 0x166   : > { %v460_v57 = vadd.f32 %v444_v55, %v1494_v5  ;;  %v978_v58 = vpop.f32.mrb[4].mxu0  ;;  %v479_v59 = vmul.f32 %v1560_v51, %v459_v54 }
 0x167   : > { %v482_v61 = vmul.f32 %v1560_v51, %v462_v56  ;;  %v405_v62 = vadd.f32 %v978_v58, %v1551_v40  ;;  %v396_v63 = vpop.f32.mrb[5].mxu0  ;;  %v1588_v14 = vadd.f32 %v1571_v0, %v481_v60 }
 0x168   : > { %v397_v1 = vadd.f32 %v1551_v40, %v396_v63  ;;  %v979_v2 = vpop.f32.mrb[6].mxu0  ;;  %v480_v3 = vmul.f32 %v1560_v51, %v460_v57  ;;  %v1581_v10 = vadd.f32 %v1571_v0, %v479_v59 }
 0x169   : > { %v449_v4 = vmax.f32 %v405_v62, 0.0  ;;  %v408_v5 = vadd.f32 %v979_v2, %v1551_v40  ;;  %v399_v6 = vpop.f32.mrb[7].mxu0  ;;  %v1577_v7 = vadd.f32 %v1571_v0, %v482_v61 }
 0x16a   : > { %v447_v8 = vmax.f32 %v397_v1, 0.0  ;;  %v400_v9 = vadd.f32 %v1551_v40, %v399_v6  ;;  %v1584_v11 = vadd.f32 %v1571_v0, %v480_v3 }
 0x16b   : > { %v465_v12 = vadd.f32 %v449_v4, %v1509_v21  ;;  %v450_v13 = vmax.f32 %v408_v5, 0.0  ;;  %v516_v25 = vpack.c.bf16 %v1577_v7, %v1588_v14 }
 0x16c   : > { %v463_v15 = vadd.f32 %v447_v8, %v1501_v17  ;;  %v448_v16 = vmax.f32 %v400_v9, 0.0  ;;  %v515_v19 = vpack.c.bf16 %v1584_v11, %v1581_v10 }
 0x16d   : > { %v466_v20 = vadd.f32 %v450_v13, %v1512_v22  ;;  %v485_v32 = vmul.f32 %v1560_v51, %v465_v12 }
 0x16e   : > { %v483_v26 = vmul.f32 %v1560_v51, %v463_v15  ;;  %v464_v31 = vadd.f32 %v448_v16, %v1504_v18  ;;  %v982_v21 = vpop.f32.mrb[8].mxu0  ;;  %1004 = vmatprep.mubr.bf16.mxu1 %v515_v19 }
 0x16f   : > { %v486_v35 = vmul.f32 %v1560_v51, %v466_v20  ;;  %v421_v17 = vadd.f32 %v982_v21, %v1551_v40  ;;  %v412_v36 = vpop.f32.mrb[9].mxu0  ;;  %1005 = vmatmul.mubr.bf16.vlgmr.msra.gmra.mrb[0].mxu1 %v516_v25  ;;  %v1616_v49 = vadd.f32 %v1571_v0, %v485_v32 }
 0x170   : > { %v484_v37 = vmul.f32 %v1560_v51, %v464_v31  ;;  %v413_v22 = vadd.f32 %v1551_v40, %v412_v36  ;;  %v983_v38 = vpop.f32.mrb[10].mxu0  ;;  %v1609_v45 = vadd.f32 %v1571_v0, %v483_v26 }
 0x171   : > { %v453_v39 = vmax.f32 %v421_v17, 0.0  ;;  %v424_v41 = vadd.f32 %v983_v38, %v1551_v40  ;;  %v415_v42 = vpop.f32.mrb[11].mxu0  ;;  %v1605_v18 = vadd.f32 %v1571_v0, %v486_v35 }
 0x172   : > { %v451_v43 = vmax.f32 %v413_v22, 0.0  ;;  %v416_v44 = vadd.f32 %v1551_v40, %v415_v42  ;;  %v1612_v46 = vadd.f32 %v1571_v0, %v484_v37  ;;  %v1684_v42 = vld [vmem:[%s1826_s3 + $0x4] ss:$0 sm:$0xff] }
 0x173   : > { %v469_v47 = vadd.f32 %v453_v39, %v1525_v27  ;;  %v454_v48 = vmax.f32 %v424_v41, 0.0  ;;  %v518_v55 = vpack.c.bf16 %v1605_v18, %v1616_v49 }
 0x174   : > { %v467_v50 = vadd.f32 %v451_v43, %v1515_v23  ;;  %v452_v52 = vmax.f32 %v416_v44, 0.0  ;;  %v517_v53 = vpack.c.bf16 %v1612_v46, %v1609_v45 }
 0x175   : > { %v470_v54 = vadd.f32 %v454_v48, %v1528_v28  ;;  %v489_v58 = vmul.f32 %v1560_v51, %v469_v47 }
 0x176   : > { %v487_v56 = vmul.f32 %v1560_v51, %v467_v50  ;;  %v468_v57 = vadd.f32 %v452_v52, %v1518_v24  ;;  %v986_v27 = vpop.f32.mrb[12].mxu0  ;;  %1008 = vmatprep.mubr.bf16.mxu1 %v517_v53  ;;  %v1691_v50 = vld [vmem:[%s1826_s3 + $0x5] ss:$0 sm:$0xff] }
 0x177   : > { %v490_v59 = vmul.f32 %v1560_v51, %v470_v54  ;;  %v437_v23 = vadd.f32 %v986_v27, %v1551_v40  ;;  %v428_v60 = vpop.f32.mrb[13].mxu0  ;;  %1009 = vmatmul.mubr.bf16.gmra.mrb[4].mxu1 %v518_v55  ;;  %v1644_v12 = vadd.f32 %v1571_v0, %v489_v58 }
 0x178   : > { %v488_v61 = vmul.f32 %v1560_v51, %v468_v57  ;;  %v429_v28 = vadd.f32 %v1551_v40, %v428_v60  ;;  %v987_v62 = vpop.f32.mrb[14].mxu0  ;;  %v1637_v5 = vadd.f32 %v1571_v0, %v487_v56 }
 0x179   : > { %v457_v63 = vmax.f32 %v437_v23, 0.0  ;;  %v440_v1 = vadd.f32 %v987_v62, %v1551_v40  ;;  %v431_v2 = vpop.f32.mrb[15].mxu0  ;;  %v1633_v24 = vadd.f32 %v1571_v0, %v490_v59 }
 0x17a   : > { %v455_v3 = vmax.f32 %v429_v28, 0.0  ;;  %v432_v4 = vadd.f32 %v1551_v40, %v431_v2  ;;  %v1640_v6 = vadd.f32 %v1571_v0, %v488_v61 }
 0x17b   : > { %v473_v8 = vadd.f32 %v457_v63, %v1541_v33  ;;  %v458_v9 = vmax.f32 %v440_v1, 0.0  ;;  %v520_v19 = vpack.c.bf16 %v1633_v24, %v1644_v12 }
 0x17c   : > { %v471_v13 = vadd.f32 %v455_v3, %v1531_v29  ;;  %v456_v15 = vmax.f32 %v432_v4, 0.0  ;;  %v519_v16 = vpack.c.bf16 %v1640_v6, %v1637_v5 }
 0x17d   : > { %v474_v40 = vadd.f32 %v458_v9, %v1544_v34  ;;  %v493_v33 = vmul.f32 %v1560_v51, %v473_v8 }
 0x17e   : > { %v491_v20 = vmul.f32 %v1560_v51, %v471_v13  ;;  %v472_v25 = vadd.f32 %v456_v15, %v1534_v30  ;;  %1012 = vmatprep.mubr.bf16.mxu1 %v519_v16 }
 0x17f   : > { %v494_v26 = vmul.f32 %v1560_v51, %v474_v40  ;;  %1013 = vmatmul.mubr.bf16.gmra.mrb[8].mxu1 %v520_v19  ;;  %v1667_v32 = vadd.f32 %v1571_v0, %v493_v33 }
 0x180   : > { %v492_v29 = vmul.f32 %v1560_v51, %v472_v25  ;;  %v1661_v34 = vadd.f32 %v1571_v0, %v491_v20  ;;  %v1676_v51 = vld [vmem:[%s1826_s3 + $0x3] ss:$0 sm:$0xff] }
 0x181   : > { %v1658_v31 = vadd.f32 %v1571_v0, %v494_v26 }
 0x182   : > { %v1664_v21 = vadd.f32 %v1571_v0, %v492_v29 }
 0x183   : > { %v522_v35 = vpack.c.bf16 %v1658_v31, %v1667_v32 }
 0x184   : > { %v521_v30 = vpack.c.bf16 %v1664_v21, %v1661_v34 }
 0x186   : > { %1016 = vmatprep.mubr.bf16.mxu1 %v521_v30 }
 0x187   : > { %1017 = vmatmul.mubr.bf16.gmra.mrb[12].mxu1 %v522_v35 }
 0x242   : > { %v1006_v17 = vpop.f32.mrb[0].mxu1 }
 0x243   : > { %v634_v36 = vadd.f32 %v1006_v17, %v1676_v51  ;;  %v625_v37 = vpop.f32.mrb[1].mxu1 }
 0x244   : > { %v626_v0 = vadd.f32 %v1676_v51, %v625_v37  ;;  %v1007_v22 = vpop.f32.mrb[2].mxu1 }
 0x245   : > { %v690_v38 = vmax.f32 %v634_v36, 0.0  ;;  %v637_v39 = vadd.f32 %v1007_v22, %v1676_v51  ;;  %v628_v41 = vpop.f32.mrb[3].mxu1 }
 0x246   : > { %v688_v43 = vmax.f32 %v626_v0, 0.0  ;;  %v629_v44 = vadd.f32 %v1676_v51, %v628_v41 }
 0x247   : > { %v706_v47 = vadd.f32 %v690_v38, %v1588_v14  ;;  %v691_v48 = vmax.f32 %v637_v39, 0.0 }
 0x248   : > { %v704_v52 = vadd.f32 %v688_v43, %v1581_v10  ;;  %v689_v53 = vmax.f32 %v629_v44, 0.0 }
 0x249   : > { %v726_v54 = vmul.f32 %v1684_v42, %v706_v47  ;;  %v707_v55 = vadd.f32 %v691_v48, %v1577_v7 }
 0x24a   : > { %v724_v56 = vmul.f32 %v1684_v42, %v704_v52  ;;  %v705_v57 = vadd.f32 %v689_v53, %v1584_v11  ;;  %v1010_v27 = vpop.f32.mrb[4].mxu1 }
 0x24b   : > { %v746_v14 = vadd.f32 %v1691_v50, %v726_v54  ;;  %v727_v58 = vmul.f32 %v1684_v42, %v707_v55  ;;  %v650_v59 = vadd.f32 %v1010_v27, %v1676_v51  ;;  %v641_v23 = vpop.f32.mrb[5].mxu1 }
 0x24c   : > { %v744_v60 = vadd.f32 %v1691_v50, %v724_v56  ;;  %v725_v10 = vmul.f32 %v1684_v42, %v705_v57  ;;  %v642_v61 = vadd.f32 %v1676_v51, %v641_v23  ;;  %v1011_v28 = vpop.f32.mrb[6].mxu1 }
 0x24d   : > { %762 = vst [vmem:[%s1706_s25 + $0x10] sm:$0xff] %v746_v14  ;;  %v747_v7 = vadd.f32 %v1691_v50, %v727_v58  ;;  %v694_v11 = vmax.f32 %v650_v59, 0.0  ;;  %v653_v62 = vadd.f32 %v1011_v28, %v1676_v51  ;;  %v644_v63 = vpop.f32.mrb[7].mxu1 }
 0x24e   : > { %760 = vst [vmem:[%s1706_s25] sm:$0xff] %v744_v60  ;;  %v745_v1 = vadd.f32 %v1691_v50, %v725_v10  ;;  %v692_v2 = vmax.f32 %v642_v61, 0.0  ;;  %v645_v3 = vadd.f32 %v1676_v51, %v644_v63 }
 0x24f   : > { %763 = vst [vmem:[%s1706_s25 + $0x18] sm:$0xff] %v747_v7  ;;  %v710_v4 = vadd.f32 %v694_v11, %v1616_v49  ;;  %v695_v8 = vmax.f32 %v653_v62, 0.0 }
 0x250   : > { %761 = vst [vmem:[%s1706_s25 + $0x8] sm:$0xff] %v745_v1  ;;  %v708_v9 = vadd.f32 %v692_v2, %v1609_v45  ;;  %v693_v13 = vmax.f32 %v645_v3, 0.0 }
 0x251   : > { %v730_v15 = vmul.f32 %v1684_v42, %v710_v4  ;;  %v711_v16 = vadd.f32 %v695_v8, %v1605_v18 }
 0x252   : > { %v728_v40 = vmul.f32 %v1684_v42, %v708_v9  ;;  %v709_v19 = vadd.f32 %v693_v13, %v1612_v46  ;;  %v1014_v20 = vpop.f32.mrb[8].mxu1 }
 0x253   : > { %v750_v25 = vadd.f32 %v1691_v50, %v730_v15  ;;  %v731_v49 = vmul.f32 %v1684_v42, %v711_v16  ;;  %v666_v33 = vadd.f32 %v1014_v20, %v1676_v51  ;;  %v657_v26 = vpop.f32.mrb[9].mxu1 }
 0x254   : > { %v748_v45 = vadd.f32 %v1691_v50, %v728_v40  ;;  %v729_v29 = vmul.f32 %v1684_v42, %v709_v19  ;;  %v658_v18 = vadd.f32 %v1676_v51, %v657_v26  ;;  %v1015_v30 = vpop.f32.mrb[10].mxu1 }
 0x255   : > { %766 = vst [vmem:[%s1706_s25 + $0x30] sm:$0xff] %v750_v25  ;;  %v751_v46 = vadd.f32 %v1691_v50, %v731_v49  ;;  %v698_v35 = vmax.f32 %v666_v33, 0.0  ;;  %v669_v17 = vadd.f32 %v1015_v30, %v1676_v51  ;;  %v660_v36 = vpop.f32.mrb[11].mxu1 }
 0x256   : > { %764 = vst [vmem:[%s1706_s25 + $0x20] sm:$0xff] %v748_v45  ;;  %v749_v37 = vadd.f32 %v1691_v50, %v729_v29  ;;  %v696_v0 = vmax.f32 %v658_v18, 0.0  ;;  %v661_v22 = vadd.f32 %v1676_v51, %v660_v36 }
 0x257   : > { %767 = vst [vmem:[%s1706_s25 + $0x38] sm:$0xff] %v751_v46  ;;  %v714_v38 = vadd.f32 %v698_v35, %v1644_v12  ;;  %v699_v39 = vmax.f32 %v669_v17, 0.0 }
 0x258   : > { %765 = vst [vmem:[%s1706_s25 + $0x28] sm:$0xff] %v749_v37  ;;  %v712_v41 = vadd.f32 %v696_v0, %v1637_v5  ;;  %v697_v43 = vmax.f32 %v661_v22, 0.0 }
 0x259   : > { %v734_v44 = vmul.f32 %v1684_v42, %v714_v38  ;;  %v715_v47 = vadd.f32 %v699_v39, %v1633_v24 }
 0x25a   : > { %v732_v48 = vmul.f32 %v1684_v42, %v712_v41  ;;  %v713_v52 = vadd.f32 %v697_v43, %v1640_v6  ;;  %v1018_v53 = vpop.f32.mrb[12].mxu1 }
 0x25b   : > { %v754_v54 = vadd.f32 %v1691_v50, %v734_v44  ;;  %v735_v12 = vmul.f32 %v1684_v42, %v715_v47  ;;  %v682_v55 = vadd.f32 %v1018_v53, %v1676_v51  ;;  %v673_v56 = vpop.f32.mrb[13].mxu1 }
 0x25c   : > { %v752_v5 = vadd.f32 %v1691_v50, %v732_v48  ;;  %v733_v57 = vmul.f32 %v1684_v42, %v713_v52  ;;  %v674_v24 = vadd.f32 %v1676_v51, %v673_v56  ;;  %v1019_v27 = vpop.f32.mrb[14].mxu1 }
 0x25d   : > { %770 = vst [vmem:[%s1706_s25 + $0x50] sm:$0xff] %v754_v54  ;;  %v755_v6 = vadd.f32 %v1691_v50, %v735_v12  ;;  %v702_v14 = vmax.f32 %v682_v55, 0.0  ;;  %v685_v58 = vadd.f32 %v1019_v27, %v1676_v51  ;;  %v676_v59 = vpop.f32.mrb[15].mxu1 }
 0x25e   : > { %768 = vst [vmem:[%s1706_s25 + $0x40] sm:$0xff] %v752_v5  ;;  %v753_v23 = vadd.f32 %v1691_v50, %v733_v57  ;;  %v700_v60 = vmax.f32 %v674_v24, 0.0  ;;  %v677_v10 = vadd.f32 %v1676_v51, %v676_v59 }
 0x25f   : > { %771 = vst [vmem:[%s1706_s25 + $0x58] sm:$0xff] %v755_v6  ;;  %v718_v61 = vadd.f32 %v702_v14, %v1667_v32  ;;  %v703_v28 = vmax.f32 %v685_v58, 0.0 }
 0x260   : > { %769 = vst [vmem:[%s1706_s25 + $0x48] sm:$0xff] %v753_v23  ;;  %v716_v7 = vadd.f32 %v700_v60, %v1661_v34  ;;  %v701_v11 = vmax.f32 %v677_v10, 0.0 }
 0x261   : > { %v738_v62 = vmul.f32 %v1684_v42, %v718_v61  ;;  %v719_v63 = vadd.f32 %v703_v28, %v1658_v31 }
 0x262   : > { %v736_v1 = vmul.f32 %v1684_v42, %v716_v7  ;;  %v717_v51 = vadd.f32 %v701_v11, %v1664_v21 }
 0x263   : > { %v758_v32 = vadd.f32 %v1691_v50, %v738_v62  ;;  %v739_v34 = vmul.f32 %v1684_v42, %v719_v63 }
 0x264   : > { %v756_v2 = vadd.f32 %v1691_v50, %v736_v1  ;;  %v737_v3 = vmul.f32 %v1684_v42, %v717_v51 }
 0x265   : > { %774 = vst [vmem:[%s1706_s25 + $0x70] sm:$0xff] %v758_v32  ;;  %v759_v31 = vadd.f32 %v1691_v50, %v739_v34 }
 0x266   : > { %772 = vst [vmem:[%s1706_s25 + $0x60] sm:$0xff] %v756_v2  ;;  %v757_v21 = vadd.f32 %v1691_v50, %v737_v3 }
 0x267   : > { %775 = vst [vmem:[%s1706_s25 + $0x78] sm:$0xff] %v759_v31 }
 0x268   : > { %773 = vst [vmem:[%s1706_s25 + $0x68] sm:$0xff] %v757_v21 }
 0x269   : > { %1208 = shalt.err (!%p1205_p2)
}
 0x26a   : > { %s1209_s24 = scalar_lea.hbm %s1773_s23, 2048  ;;  %s1213_s11 = scalar_lea.hbm %s1827_s4, 4096 }
 0x26b   : > { %p1210_p13 = scmp.ne.s32.totalorder %s1773_s23, %s1209_s24  ;;  %p1214_p4 = scmp.lt.u32.totalorder %s1773_s23, %s1827_s4 }
 0x26c   : > { %p1215_p5 = scmp.lt.u32.totalorder %s1213_s11, %s1209_s24  ;;  %p1217_p11 = scmp.lt.u32.totalorder %s1209_s24, %s1773_s23 }
 0x26d   : > { %p1211_p6 = pnand %p1210_p13, %p1841_p0 }
 0x26e   : > { %p1216_p8 = por %p1215_p5, %p1214_p4 }
 0x26f   : > { %p1212_p10 = pneg %p1211_p6 }
 0x270   : > { %p1218_p1 = por %p1217_p11, %p1216_p8 }
 0x272   : > { %p1219_p3 = pnand %p1218_p1, %p1212_p10 }
 0x274   : > { %1222 = shalt.err (!%p1219_p3)
}
 0x275   : > { %s1275_s25 = smov 128   ;;  %s1276_s8 = smov 8  }
 0x276   : > { %1030 = dma.vmem_to_hbm [thread:$0]  (%p1841_p0), %s1775_s26, 2048, %s1773_s23, %s777_s19, %s1275_s25, %s1275_s25, %s1276_s8  }
 0x277 PF: > { %s805_s10 = sand.u32 1, %s1253_s15   ;;  %p1842_p7 = scmp.ne.s32.totalorder %s1832_s22, 0 }
 0x278   : > { %p1843_p9 = scmp.ge.s32.totalorder %s1265_s18, 2  ;;  %s806_s21 = scalar_lea.sflag [#allocation4], %s805_s10 }
 0x27a   : > { %p1044_p12 = pnand %p1843_p9, %p1842_p7 }
 0x27c   : > { %1248 = dma.done.wait (!%p1044_p12), %s806_s21, 2048  }
 0x27d   : > { %1250 = vsyncadd (!%p1044_p12), %s806_s21, 4294965248  ;;  %p18_p2 = scmp.ge.s32.totalorder %s1412_s9, 4   ;;  %s1844_s15 = smov %s1257_s16 }
 0x27e   : > { %s1845_s16 = smov %s1261_s17  ;;  %s1846_s17 = smov %s1428_s14 }
 0x27f   : > { %s1847_s18 = smov %s1412_s9  ;;  %20 = sbr.rel (!%p18_p2) target bundleno = 6 (0x6), region = 89 }
 0x286   :  { %811 = vsyncpa [#allocation3], 1 }
 0x287   :  { %813 = vsyncpa [#allocation3 + $0x1], 1 }
 0x288   :  { %814 = vsyncpa [#allocation6], 1 }
 0x289   :  { %815 = vsyncpa [#allocation4], 1 }
 0x28a   :  { %817 = vsyncpa [#allocation4 + $0x1], 1 }

</bundles_post_ra>
